<compile_context>
chip_gen: v7x
topology: tpu7x:2x2x1
jax: 0.10.0
libtpu: 0.0.40
codegen_flags: <defaults>
</compile_context>

<pallas_src>
import jax
import jax.numpy as jnp
import numpy as np
from jax import lax
from jax.experimental import pallas as pl
from jax.experimental.pallas import tpu as pltpu


def mlp_kernel(x_ref, w1_ref, b1_ref, w2_ref, b2_ref, w3_ref, b3_ref,
               logit_thr_ref, prelu_ref, slab_ref):
    """Full MLP hot path.  x tile is (block_b, d_in); activations are kept in
    transposed (features, block_b) layout so the batch sits on the lane axis."""
    a = prelu_ref[0]                       # shared PReLU slope (scalar, SMEM)

    # hidden layer 0: Linear + PReLU.  Contract d_in of W (axis 1) against
    # d_in of the x tile (axis 1) -> (hidden0, block_b); no wrapper transpose.
    h = lax.dot_general(w1_ref[...], x_ref[...],
                        dimension_numbers=(((1,), (1,)), ((), ())),
                        preferred_element_type=jnp.float32) + b1_ref[...]
    h = jnp.where(h > 0.0, h, a * h)

    # hidden layer 1: Linear + PReLU
    h = jnp.dot(w2_ref[...], h, preferred_element_type=jnp.float32) + b2_ref[...]
    h = jnp.where(h > 0.0, h, a * h)

    # final layer logits
    z = jnp.dot(w3_ref[...], h, preferred_element_type=jnp.float32) + b3_ref[...]

    # sigmoid (exact) for the probability output
    out = 1.0 / (1.0 + jnp.exp(-z))                          # (nclasses, block_b)

    # threshold_predictions in logit space: (sigmoid(z) > thr) <=> (z > logit(thr))
    clf = (z > logit_thr_ref[...]).astype(jnp.float32)       # (nclasses, block_b)

    # one full-height, lane-dense, unmasked store of both results
    slab_ref[...] = jnp.concatenate([out, clf], axis=0)      # (2*nclasses, block_b)


def _pick_block_b(B):
    """Batch-tile policy: single block for small B (1-TC chips); for large B
    prefer big lane-dense tiles with an even step count >= 4 (2-TC v7x)."""
    if B <= 512:
        return B
    cands = (8192, 4096, 2048, 1024, 512, 256, 128)
    for cand in cands:                       # >= 4 even steps if possible
        if B % cand == 0 and B // cand >= 4 and (B // cand) % 2 == 0:
            return cand
    for cand in cands:                       # fall back: at least 2 steps
        if B % cand == 0 and B // cand >= 2:
            return cand
    return B                                 # odd batch: single full block


def multilayer_binary_classifier(x, params, thresholds, *, block_b=None):
    """x: (B, d_in) float32.  Returns (out, clf_out), each (B, nclasses)."""
    w1, b1, w2, b2, w3, b3, prelu_a = params
    B, d_in = x.shape
    nclasses = w3.shape[0]

    if block_b is None:
        block_b = _pick_block_b(B)
    assert B % block_b == 0
    assert block_b == B or block_b % 8 == 0, (
        "batch tile must be sublane-aligned (multiple of 8) or the full batch")

    # thresholds in logit space (0.5 -> 0.0): exact classification from logits
    logit_thr = jnp.log(thresholds / (1.0 - thresholds)).astype(jnp.float32)

    def full(shape):                       # whole-array block, resident each step
        return pl.BlockSpec(shape, lambda i: (0,) * len(shape))

    slab = pl.pallas_call(
        mlp_kernel,
        grid=(B // block_b,),
        in_specs=[
            pl.BlockSpec((block_b, d_in), lambda i: (i, 0)),   # native x layout
            full(w1.shape), full(b1.shape),
            full(w2.shape), full(b2.shape),
            full(w3.shape), full(b3.shape),
            full(logit_thr.shape),                             # (nclasses, 1) VMEM
            pl.BlockSpec(memory_space=pltpu.MemorySpace.SMEM), # PReLU slope scalar
        ],
        out_specs=pl.BlockSpec((2 * nclasses, block_b), lambda i: (0, i)),
        out_shape=jax.ShapeDtypeStruct((2 * nclasses, B), jnp.float32),
        compiler_params=pltpu.CompilerParams(
            dimension_semantics=("parallel",),      # shard grid across TCs (v7x)
            vmem_limit_bytes=32 * 1024 * 1024,      # safe on 64 MiB v7x VMEM
        ),
    )(x, w1, b1, w2, b2, w3, b3, logit_thr, prelu_a)

    # single transpose of the whole slab, then cheap slices
    slab_t = slab.T                        # (B, 2*nclasses)
    out = slab_t[:, :nclasses]
    clf = slab_t[:, nclasses:]
    return out, clf


def init_params(key, layer_sizes):
    """PyTorch-style init: U(-1/sqrt(fan_in), 1/sqrt(fan_in)); W is (out, in)."""
    params = []
    for i in range(len(layer_sizes) - 1):
        fan_in, fan_out = layer_sizes[i], layer_sizes[i + 1]
        key, kw, kb = jax.random.split(key, 3)
        bound = 1.0 / np.sqrt(fan_in)
        w = jax.random.uniform(kw, (fan_out, fan_in), jnp.float32, -bound, bound)
        b = jax.random.uniform(kb, (fan_out, 1), jnp.float32, -bound, bound)
        params += [w, b]
    # single shared PReLU parameter (PyTorch default init = 0.25), kept in SMEM
    params.append(jnp.full((1,), 0.25, dtype=jnp.float32))
    return params


def reference_forward(x, params, thresholds):
    w1, b1, w2, b2, w3, b3, a = params
    a = a[0]
    h = x @ w1.T + b1[:, 0]
    h = jnp.where(h > 0.0, h, a * h)
    h = h @ w2.T + b2[:, 0]
    h = jnp.where(h > 0.0, h, a * h)
    out = jax.nn.sigmoid(h @ w3.T + b3[:, 0])
    clf = (out > thresholds[:, 0]).astype(jnp.float32)
    return out, clf


if __name__ == "__main__":
    # module config: MultiLayerBinaryClassifier(input_layer_size=32,
    #                                           layer_sizes=[32, 16, 4])
    input_layer_size = 32
    layer_sizes = [input_layer_size, 32, 16, 4]       # self.layer_sizes
    nclasses = layer_sizes[-1]
    batch = 256                                       # small batch -> 1 grid step

    key = jax.random.PRNGKey(0)
    key, kx = jax.random.split(key)
    x = jax.random.normal(kx, (batch, input_layer_size), dtype=jnp.float32)

    params = init_params(key, layer_sizes)
    thresholds = jnp.full((nclasses, 1), 0.5, dtype=jnp.float32)  # [0.5]*nclasses

    out, clf_out = multilayer_binary_classifier(x, params, thresholds)
    out, clf_out = jax.block_until_ready((out, clf_out))

    ref_out, ref_clf = reference_forward(x, params, thresholds)
    np.testing.assert_allclose(np.asarray(out), np.asarray(ref_out),
                               rtol=1e-5, atol=1e-5)
    # clf is computed in logit space (mathematically identical to thresholding
    # the exact sigmoid), so it matches the reference exactly.
    np.testing.assert_array_equal(np.asarray(clf_out), np.asarray(ref_clf))

    print("KERNEL_OK")
</pallas_src>

<mosaic_0001>
module attributes {stable_mosaic.version = 11 : i64} {
  func.func @mlp_kernel(%arg0: i32, %arg1: memref<256x32xf32, #tpu.memory_space<vmem>>, %arg2: memref<32x32xf32, #tpu.memory_space<vmem>>, %arg3: memref<32x1xf32, #tpu.memory_space<vmem>>, %arg4: memref<16x32xf32, #tpu.memory_space<vmem>>, %arg5: memref<16x1xf32, #tpu.memory_space<vmem>>, %arg6: memref<4x16xf32, #tpu.memory_space<vmem>>, %arg7: memref<4x1xf32, #tpu.memory_space<vmem>>, %arg8: memref<4x1xf32, #tpu.memory_space<vmem>>, %arg9: memref<1xf32, #tpu.memory_space<smem>>, %arg10: memref<8x256xf32, #tpu.memory_space<vmem>>) attributes {dimension_semantics = [#tpu.dimension_semantics<parallel>], iteration_bounds = array<i64: 1>, scalar_prefetch = 0 : i64, scratch_operands = 0 : i64, tpu.core_type = #tpu.core_type<tc>, window_params = [{transform_indices = @transform_0, window_bounds = array<i64: 256, 32>}, {pipeline_mode = #tpu.pipeline_mode<synchronous>, transform_indices = @transform_1, window_bounds = array<i64: 32, 32>}, {pipeline_mode = #tpu.pipeline_mode<synchronous>, transform_indices = @transform_2, window_bounds = array<i64: 32, 1>}, {pipeline_mode = #tpu.pipeline_mode<synchronous>, transform_indices = @transform_3, window_bounds = array<i64: 16, 32>}, {pipeline_mode = #tpu.pipeline_mode<synchronous>, transform_indices = @transform_4, window_bounds = array<i64: 16, 1>}, {pipeline_mode = #tpu.pipeline_mode<synchronous>, transform_indices = @transform_5, window_bounds = array<i64: 4, 16>}, {pipeline_mode = #tpu.pipeline_mode<synchronous>, transform_indices = @transform_6, window_bounds = array<i64: 4, 1>}, {pipeline_mode = #tpu.pipeline_mode<synchronous>, transform_indices = @transform_7, window_bounds = array<i64: 4, 1>}, {transform_indices = @transform_8, window_bounds = array<i64: 1>}, {transform_indices = @transform_9, window_bounds = array<i64: 8, 256>}]} {
    %c0 = arith.constant 0 : index
    %0 = memref.load %arg9[%c0] : memref<1xf32, #tpu.memory_space<smem>>
    %c0_0 = arith.constant 0 : index
    %c0_1 = arith.constant 0 : index
    %1 = vector.load %arg2[%c0_0, %c0_1] : memref<32x32xf32, #tpu.memory_space<vmem>>, vector<32x32xf32>
    %c0_2 = arith.constant 0 : index
    %c0_3 = arith.constant 0 : index
    %2 = vector.load %arg1[%c0_2, %c0_3] : memref<256x32xf32, #tpu.memory_space<vmem>>, vector<256x32xf32>
    %cst = arith.constant dense<0.000000e+00> : vector<32x256xf32>
    %3 = tpu.matmul %1, %2, %cst {dimension_numbers = #tpu.dot_dimension_numbers<[1], [1], [0], [0], [0, 0, 1, 0], [], []>} : vector<32x32xf32>, vector<256x32xf32>, vector<32x256xf32> -> vector<32x256xf32>
    %c0_4 = arith.constant 0 : index
    %c0_5 = arith.constant 0 : index
    %4 = vector.load %arg3[%c0_4, %c0_5] : memref<32x1xf32, #tpu.memory_space<vmem>>, vector<32x1xf32>
    %5 = vector.broadcast %4 : vector<32x1xf32> to vector<32x256xf32>
    %6 = arith.addf %3, %5 : vector<32x256xf32>
    %cst_6 = arith.constant 0.000000e+00 : f32
    %7 = vector.broadcast %cst_6 : f32 to vector<32x256xf32>
    %8 = arith.cmpf ogt, %6, %7 : vector<32x256xf32>
    %9 = vector.broadcast %0 : f32 to vector<32x256xf32>
    %10 = arith.mulf %9, %6 : vector<32x256xf32>
    %11 = arith.select %8, %6, %10 : vector<32x256xi1>, vector<32x256xf32>
    %c0_7 = arith.constant 0 : index
    %c0_8 = arith.constant 0 : index
    %12 = vector.load %arg4[%c0_7, %c0_8] : memref<16x32xf32, #tpu.memory_space<vmem>>, vector<16x32xf32>
    %cst_9 = arith.constant dense<0.000000e+00> : vector<16x256xf32>
    %13 = tpu.matmul %12, %11, %cst_9 {dimension_numbers = #tpu.dot_dimension_numbers<[1], [0], [0], [1], [0, 0, 1, 1], [], []>} : vector<16x32xf32>, vector<32x256xf32>, vector<16x256xf32> -> vector<16x256xf32>
    %c0_10 = arith.constant 0 : index
    %c0_11 = arith.constant 0 : index
    %14 = vector.load %arg5[%c0_10, %c0_11] : memref<16x1xf32, #tpu.memory_space<vmem>>, vector<16x1xf32>
    %15 = vector.broadcast %14 : vector<16x1xf32> to vector<16x256xf32>
    %16 = arith.addf %13, %15 : vector<16x256xf32>
    %cst_12 = arith.constant 0.000000e+00 : f32
    %17 = vector.broadcast %cst_12 : f32 to vector<16x256xf32>
    %18 = arith.cmpf ogt, %16, %17 : vector<16x256xf32>
    %19 = vector.broadcast %0 : f32 to vector<16x256xf32>
    %20 = arith.mulf %19, %16 : vector<16x256xf32>
    %21 = arith.select %18, %16, %20 : vector<16x256xi1>, vector<16x256xf32>
    %c0_13 = arith.constant 0 : index
    %c0_14 = arith.constant 0 : index
    %22 = vector.load %arg6[%c0_13, %c0_14] : memref<4x16xf32, #tpu.memory_space<vmem>>, vector<4x16xf32>
    %cst_15 = arith.constant dense<0.000000e+00> : vector<4x256xf32>
    %23 = tpu.matmul %22, %21, %cst_15 {dimension_numbers = #tpu.dot_dimension_numbers<[1], [0], [0], [1], [0, 0, 1, 1], [], []>} : vector<4x16xf32>, vector<16x256xf32>, vector<4x256xf32> -> vector<4x256xf32>
    %c0_16 = arith.constant 0 : index
    %c0_17 = arith.constant 0 : index
    %24 = vector.load %arg7[%c0_16, %c0_17] : memref<4x1xf32, #tpu.memory_space<vmem>>, vector<4x1xf32>
    %25 = vector.broadcast %24 : vector<4x1xf32> to vector<4x256xf32>
    %26 = arith.addf %23, %25 : vector<4x256xf32>
    %cst_18 = arith.constant 0.000000e+00 : f32
    %27 = vector.broadcast %cst_18 : f32 to vector<4x256xf32>
    %28 = arith.subf %27, %26 : vector<4x256xf32>
    %29 = math.exp %28 : vector<4x256xf32>
    %cst_19 = arith.constant 1.000000e+00 : f32
    %30 = vector.broadcast %cst_19 : f32 to vector<4x256xf32>
    %31 = arith.addf %30, %29 : vector<4x256xf32>
    %cst_20 = arith.constant 1.000000e+00 : f32
    %32 = vector.broadcast %cst_20 : f32 to vector<4x256xf32>
    %33 = arith.divf %32, %31 : vector<4x256xf32>
    %c0_21 = arith.constant 0 : index
    %c0_22 = arith.constant 0 : index
    %34 = vector.load %arg8[%c0_21, %c0_22] : memref<4x1xf32, #tpu.memory_space<vmem>>, vector<4x1xf32>
    %35 = vector.broadcast %34 : vector<4x1xf32> to vector<4x256xf32>
    %36 = arith.cmpf ogt, %26, %35 : vector<4x256xf32>
    %37 = arith.extui %36 : vector<4x256xi1> to vector<4x256xi32>
    %38 = arith.sitofp %37 : vector<4x256xi32> to vector<4x256xf32>
    %39 = tpu.concatenate %33, %38 in 0 : vector<4x256xf32>, vector<4x256xf32> -> vector<8x256xf32>
    %c0_23 = arith.constant 0 : index
    %c0_24 = arith.constant 0 : index
    %40 = vector.load %arg10[%c0_23, %c0_24] : memref<8x256xf32, #tpu.memory_space<vmem>>, vector<8x256xf32>
    tpu.vector_store %arg10[%c0_23, %c0_24], %39 {strides = array<i32>} : memref<8x256xf32, #tpu.memory_space<vmem>>, vector<8x256xf32>,
    return
  }
  func.func @transform_0(%arg0: i32) -> (i32, i32) {
    %c0_i32 = arith.constant 0 : i32
    %c0_i32_0 = arith.constant 0 : i32
    return %arg0, %c0_i32 : i32, i32
  }
  func.func @transform_1(%arg0: i32) -> (i32, i32) {
    %c0_i32 = arith.constant 0 : i32
    %c0_i32_0 = arith.constant 0 : i32
    %c0_i32_1 = arith.constant 0 : i32
    return %c0_i32, %c0_i32_0 : i32, i32
  }
  func.func @transform_2(%arg0: i32) -> (i32, i32) {
    %c0_i32 = arith.constant 0 : i32
    %c0_i32_0 = arith.constant 0 : i32
    %c0_i32_1 = arith.constant 0 : i32
    return %c0_i32, %c0_i32_0 : i32, i32
  }
  func.func @transform_3(%arg0: i32) -> (i32, i32) {
    %c0_i32 = arith.constant 0 : i32
    %c0_i32_0 = arith.constant 0 : i32
    %c0_i32_1 = arith.constant 0 : i32
    return %c0_i32, %c0_i32_0 : i32, i32
  }
  func.func @transform_4(%arg0: i32) -> (i32, i32) {
    %c0_i32 = arith.constant 0 : i32
    %c0_i32_0 = arith.constant 0 : i32
    %c0_i32_1 = arith.constant 0 : i32
    return %c0_i32, %c0_i32_0 : i32, i32
  }
  func.func @transform_5(%arg0: i32) -> (i32, i32) {
    %c0_i32 = arith.constant 0 : i32
    %c0_i32_0 = arith.constant 0 : i32
    %c0_i32_1 = arith.constant 0 : i32
    return %c0_i32, %c0_i32_0 : i32, i32
  }
  func.func @transform_6(%arg0: i32) -> (i32, i32) {
    %c0_i32 = arith.constant 0 : i32
    %c0_i32_0 = arith.constant 0 : i32
    %c0_i32_1 = arith.constant 0 : i32
    return %c0_i32, %c0_i32_0 : i32, i32
  }
  func.func @transform_7(%arg0: i32) -> (i32, i32) {
    %c0_i32 = arith.constant 0 : i32
    %c0_i32_0 = arith.constant 0 : i32
    %c0_i32_1 = arith.constant 0 : i32
    return %c0_i32, %c0_i32_0 : i32, i32
  }
  func.func @transform_8(%arg0: i32) -> i32 {
    %c0_i32 = arith.constant 0 : i32
    %c0_i32_0 = arith.constant 0 : i32
    return %c0_i32 : i32
  }
  func.func @transform_9(%arg0: i32) -> (i32, i32) {
    %c0_i32 = arith.constant 0 : i32
    %c0_i32_0 = arith.constant 0 : i32
    return %c0_i32, %arg0 : i32, i32
  }
}

</mosaic_0001>

<bundles_post_ra>
// kernel: tpu_custom_call.1
= control target key start
LH: loop header
LB: loop body
LE: loop exit
PB: predicated region body
PF: predicated region fallthrough
CT: control target
= control target key end

     0   :  { %vm95_vm0 = vcmask 261120   ;;  %v736_v7 = vmov 0   ;;  %s1016_s0 = inlined_call_operand.vmem [shape: f32[256,32], index: 0, kind: input, shape index: {}]   ;;  %s1017_s1 = inlined_call_operand.vmem [shape: f32[32,32], index: 1, kind: input, shape index: {}]   ;;  %s1018_s2 = inlined_call_operand.vmem [shape: f32[32,1], index: 2, kind: input, shape index: {}]   ;;  %s1019_s3 = inlined_call_operand.vmem [shape: f32[16,32], index: 3, kind: input, shape index: {}]   ;;  %s1020_s4 = inlined_call_operand.vmem [shape: f32[16,1], index: 4, kind: input, shape index: {}]   ;;  %s1021_s5 = inlined_call_operand.vmem [shape: f32[4,16], index: 5, kind: input, shape index: {}]   ;;  %s1022_s6 = inlined_call_operand.vmem [shape: f32[4,1], index: 6, kind: input, shape index: {}]   ;;  %s1023_s7 = inlined_call_operand.vmem [shape: f32[4,1], index: 7, kind: input, shape index: {}]   ;;  %s1024_s8 = inlined_call_operand.<no memory space> [shape: f32[1], index: 8, kind: input, shape index: {}]   ;;  %s1025_s9 = inlined_call_operand.hbm [shape: f32[8,256], index: 9, kind: output, shape index: {}]  }
   0x1   :  { %v55_v0 = vld [vmem:[%s1016_s0 + $0x80] sm:$0xff]  ;;  %v56_v1 = vld [vmem:[%s1016_s0 + $0x88] sm:$0xff]  ;;  %vm800_vm1 = vmpackc.low %vm95_vm0, %vm95_vm0  ;;  %702 = vset.pattern.permute.xlu0 %v736_v7  ;;  %703 = vset.pattern.permute.xlu1 %v736_v7 }
   0x2   :  { %v39_v2 = vld [vmem:[%s1016_s0] sm:$0xff]  ;;  %v639_v3 = vpack.c.bf16 %v56_v1, %v55_v0  ;;  %v40_v5 = vld [vmem:[%s1016_s0 + $0x8] sm:$0xff]  ;;  %v57_v6 = vld [vmem:[%s1016_s0 + $0x90] sm:$0xff] }
   0x3   :  { %v642_v8 = vpack.c.bf16 %v40_v5, %v39_v2  ;;  %v58_v9 = vld [vmem:[%s1016_s0 + $0x98] sm:$0xff]  ;;  %v41_v11 = vld [vmem:[%s1016_s0 + $0x10] sm:$0xff]  ;;  %v59_v13 = vld [vmem:[%s1016_s0 + $0xa0] sm:$0xff] }
   0x4   :  { %641 = vmatprep.subr.msk.bf16.mxu0 %vm800_vm1, %v639_v3  ;;  %v645_v10 = vpack.c.bf16 %v58_v9, %v57_v6  ;;  %v42_v12 = vld [vmem:[%s1016_s0 + $0x18] sm:$0xff]  ;;  %v60_v14 = vld [vmem:[%s1016_s0 + $0xa8] sm:$0xff]  ;;  %v834_v17 = vld [vmem:[%s1017_s1] sm:$0xff] }
   0x5   :  { %644 = vmatpush3.bf16.xpose.msk.msra.mxu0 %vm800_vm1, %v642_v8  ;;  %v648_v15 = vpack.c.bf16 %v42_v12, %v41_v11  ;;  %v651_v16 = vpack.c.bf16 %v60_v14, %v59_v13  ;;  %631 = vmatprep.mubr.msk.f32.mxu0 %vm95_vm0, %v834_v17  ;;  %v71_v18 = vld [vmem:[%s1018_s2] sm:$0xff]  ;;  %v73_v19 = vld [vmem:[%s1018_s2 + $0x10] sm:$0xff]  ;;  %v44_v21 = vld [vmem:[%s1016_s0 + $0x28] sm:$0xff] }
   0x6   :  { %647 = vmatprep.subr.msk.bf16.mxu0 %vm800_vm1, %v645_v10  ;;  %v43_v20 = vld [vmem:[%s1016_s0 + $0x20] sm:$0xff]  ;;  %77 = vperm.xlu0 %702, %v71_v18   ;;  %v61_v22 = vld [vmem:[%s1016_s0 + $0xb0] sm:$0xff]  ;;  %v62_v23 = vld [vmem:[%s1016_s0 + $0xb8] sm:$0xff] }
   0x7   :  { %87 = vperm.xlu1 %703, %v73_v19   ;;  %v72_v24 = vld [vmem:[%s1018_s2 + $0x8] sm:$0xff]  ;;  %v74_v25 = vld [vmem:[%s1018_s2 + $0x18] sm:$0xff] }
   0xd   :  { %650 = vmatpush3.bf16.xpose.msk.msra.mxu0 %vm800_vm1, %v648_v15 }
   0xe   :  { %653 = vmatprep.subr.msk.bf16.mxu0 %vm800_vm1, %v651_v16 }
   0xf   :  { %15 = vsyncpa [#allocation4], 0  ;;  %v654_v26 = vpack.c.bf16 %v44_v21, %v43_v20  ;;  %v657_v27 = vpack.c.bf16 %v62_v23, %v61_v22  ;;  %82 = vperm.xlu0 %702, %v72_v24   ;;  %92 = vperm.xlu1 %703, %v74_v25   ;;  %v320_v28 = vld [vmem:[%s1020_s4] sm:$0xff]  ;;  %v321_v29 = vld [vmem:[%s1020_s4 + $0x8] sm:$0xff]  ;;  %v737_v62 = vmov 0.0   ;;  %v975_v3 = vstv %s1024_s8 }
  0x10   :  { %v45_v30 = vld [vmem:[%s1016_s0 + $0x30] sm:$0xff]  ;;  %v46_v31 = vld [vmem:[%s1016_s0 + $0x38] sm:$0xff]  ;;  %v63_v32 = vld [vmem:[%s1016_s0 + $0xc0] sm:$0xff]  ;;  %402 = vmatprep.mubr.f32.mxu1 %v737_v62  ;;  %vm434_vm14 = vcmask 130048  }
  0x11   :  { %v64_v33 = vld [vmem:[%s1016_s0 + $0xc8] sm:$0xff]  ;;  %v428_v34 = vld [vmem:[%s1022_s6] sm:$0xf]  ;;  %v660_v36 = vpack.c.bf16 %v46_v31, %v45_v30  ;;  %v65_v40 = vld [vmem:[%s1016_s0 + $0xd0] sm:$0xff] }
  0x12   :  { %v521_v35 = vld [vmem:[%s1023_s7] sm:$0xf]  ;;  %v663_v37 = vpack.c.bf16 %v64_v33, %v63_v32  ;;  %v48_v39 = vld [vmem:[%s1016_s0 + $0x48] sm:$0xff]  ;;  %v66_v41 = vld [vmem:[%s1016_s0 + $0xd8] sm:$0xff] }
  0x13   :  { %324 = vperm.xlu0 %702, %v320_v28   ;;  %329 = vperm.xlu1 %703, %v321_v29   ;;  %v47_v38 = vld [vmem:[%s1016_s0 + $0x40] sm:$0xff]  ;;  %v669_v43 = vpack.c.bf16 %v66_v41, %v65_v40  ;;  %v49_v44 = vld [vmem:[%s1016_s0 + $0x50] sm:$0xff]  ;;  %v50_v45 = vld [vmem:[%s1016_s0 + $0x58] sm:$0xff] }
  0x14   :  { %v666_v42 = vpack.c.bf16 %v48_v39, %v47_v38  ;;  %v67_v46 = vld [vmem:[%s1016_s0 + $0xe0] sm:$0xff]  ;;  %v68_v47 = vld [vmem:[%s1016_s0 + $0xe8] sm:$0xff]  ;;  %v672_v48 = vpack.c.bf16 %v50_v45, %v49_v44  ;;  %v69_v52 = vld [vmem:[%s1016_s0 + $0xf0] sm:$0xff] }
  0x15   :  { %656 = vmatpush3.bf16.xpose.msk.msra.mxu0 %vm800_vm1, %v654_v26  ;;  %v675_v49 = vpack.c.bf16 %v68_v47, %v67_v46  ;;  %v51_v50 = vld [vmem:[%s1016_s0 + $0x60] sm:$0xff]  ;;  %v52_v51 = vld [vmem:[%s1016_s0 + $0x68] sm:$0xff]  ;;  %v70_v53 = vld [vmem:[%s1016_s0 + $0xf8] sm:$0xff] }
  0x16   :  { %659 = vmatprep.subr.msk.bf16.mxu0 %vm800_vm1, %v657_v27  ;;  %v678_v54 = vpack.c.bf16 %v52_v51, %v51_v50  ;;  %v681_v55 = vpack.c.bf16 %v70_v53, %v69_v52  ;;  %v53_v56 = vld [vmem:[%s1016_s0 + $0x70] sm:$0xff]  ;;  %v54_v57 = vld [vmem:[%s1016_s0 + $0x78] sm:$0xff]  ;;  %v36_v59 = vld [vmem:[%s1017_s1 + $0x8] sm:$0xff] }
  0x17   :  { %431 = vperm.xlu0 %702, %v428_v34   ;;  %524 = vperm.xlu1 %703, %v521_v35   ;;  %v684_v58 = vpack.c.bf16 %v54_v57, %v53_v56  ;;  %v37_v60 = vld [vmem:[%s1017_s1 + $0x10] sm:$0xff]  ;;  %v38_v61 = vld [vmem:[%s1017_s1 + $0x18] sm:$0xff]  ;;  %v318_v40 = vld [vmem:[%s1019_s3] sm:$0xff] }
  0x18   :  { %v319_v41 = vld [vmem:[%s1019_s3 + $0x8] sm:$0xff] }
  0x1d   :  { %662 = vmatpush3.bf16.xpose.msk.msra.mxu0 %vm800_vm1, %v660_v36 }
  0x1e   :  { %665 = vmatprep.subr.msk.bf16.mxu0 %vm800_vm1, %v663_v37 }
  0x25   :  { %668 = vmatpush3.bf16.xpose.msk.msra.mxu0 %vm800_vm1, %v666_v42 }
  0x26   :  { %671 = vmatprep.subr.msk.bf16.mxu0 %vm800_vm1, %v669_v43 }
  0x2d   :  { %674 = vmatpush3.bf16.xpose.msk.msra.mxu0 %vm800_vm1, %v672_v48 }
  0x2e   :  { %677 = vmatprep.subr.msk.bf16.mxu0 %vm800_vm1, %v675_v49 }
  0x35   :  { %680 = vmatpush3.bf16.xpose.msk.msra.mxu0 %vm800_vm1, %v678_v54 }
  0x36   :  { %683 = vmatprep.subr.msk.bf16.mxu0 %vm800_vm1, %v681_v55 }
  0x3d   :  { %686 = vmatpush3.bf16.xpose.msk.msra.mxu0 %vm800_vm1, %v684_v58  ;;  %vm539_vm1 = vcmask 1043456  }
  0x44   :  { %632 = vmatmul.mubr.msk.f32.vlgmr.msra.gmra.mrb[0].mxu0 %vm95_vm0, %v834_v17 }
  0x45   :  { %633 = vmatprep.mubr.msk.f32.mxu0 %vm95_vm0, %v36_v59 }
  0x48   :  { %634 = vmatmul.mubr.msk.f32.gmra.mrb[2].mxu0 %vm95_vm0, %v36_v59 }
  0x49   :  { %635 = vmatprep.mubr.msk.f32.mxu0 %vm95_vm0, %v37_v60 }
  0x4c   :  { %636 = vmatmul.mubr.msk.f32.gmra.mrb[4].mxu0 %vm95_vm0, %v37_v60 }
  0x4d   :  { %637 = vmatprep.mubr.msk.f32.mxu0 %vm95_vm0, %v38_v61 }
  0x50   :  { %638 = vmatmul.mubr.msk.f32.gmra.mrb[6].mxu0 %vm95_vm0, %v38_v61 }
  0x85   :  { %v78_v63 = vpop.permute.xlu0 %77 }
  0x86   :  { %v88_v10 = vpop.permute.xlu1 %87 }
  0x8e   :  { %v83_v5 = vpop.permute.xlu0 %82  ;;  %v93_v25 = vpop.permute.xlu1 %92 }
  0x92   :  { %v325_v42 = vpop.permute.xlu0 %324  ;;  %v330_v47 = vpop.permute.xlu1 %329 }
 0x117   :  { %v270_v0 = vpop.f32.mrb[0].mxu0 }
 0x118   :  { %v271_v1 = vadd.f32 %v270_v0, %v78_v63  ;;  %v272_v2 = vpop.f32.mrb[1].mxu0  ;;  %v432_v0 = vpop.permute.xlu0 %431 }
 0x119   :  { %v273_v4 = vadd.f32 %v272_v2, %v78_v63  ;;  %v427_v63 = vld [vmem:[%s1021_s5] sm:$0xf]  ;;  %s738_s5 = smov [#allocation3]  }
 0x11a   :  { %v302_v7 = vmul.f32 %v975_v3, %v271_v1  ;;  %vm293_vm2 = vcmp.gt.f32.partialorder %v271_v1, 0.0  ;;  %s550_s2 = sshll.u32 %s738_s5, 4  ;;  %s551_s2 = int_to_ptr.vmem [resolvable:$true] %s550_s2 }
 0x11b   :  { %v276_v6 = vpop.f32.mrb[2].mxu0  ;;  %v303_v11 = vmul.f32 %v975_v3, %v273_v4  ;;  %vm294_vm3 = vcmp.gt.f32.partialorder %v273_v4, 0.0  ;;  %s712_s30 = scalar_lea.vmem %s551_s2, 256  ;;  %p717_p1 = scmp.lt.s32.totalorder %s551_s2, %s551_s2 }
 0x11c   :  { %v277_v8 = vadd.f32 %v276_v6, %v83_v5  ;;  %v278_v9 = vpop.f32.mrb[3].mxu0  ;;  %v310_v18 = vsel %vm293_vm2, %v271_v1, %v302_v7  ;;  %p713_p0 = scmp.ne.s32.totalorder %s551_s2, %s712_s30  ;;  %p718_p2 = scmp.lt.s32.totalorder %s712_s30, %s712_s30 }
 0x11d   :  { %v279_v12 = vadd.f32 %v278_v9, %v83_v5  ;;  %v311_v21 = vsel %vm294_vm3, %v273_v4, %v303_v11 }
 0x11e   :  { %v304_v13 = vmul.f32 %v975_v3, %v277_v8  ;;  %vm295_vm4 = vcmp.gt.f32.partialorder %v277_v8, 0.0  ;;  %p719_p3 = por %p718_p2, %p717_p1 }
 0x11f   :  { %v305_v14 = vmul.f32 %v975_v3, %v279_v12  ;;  %v282_v15 = vpop.f32.mrb[4].mxu0  ;;  %vm296_vm5 = vcmp.gt.f32.partialorder %v279_v12, 0.0 }
 0x120   :  { %v283_v16 = vadd.f32 %v282_v15, %v88_v10  ;;  %v284_v17 = vpop.f32.mrb[5].mxu0  ;;  %v312_v19 = vsel %vm295_vm4, %v277_v8, %v304_v13  ;;  %v525_v13 = vpop.permute.xlu1 %524  ;;  %p720_p4 = pnand %p719_p3, %p713_p0 }
 0x121   :  { %v285_v20 = vadd.f32 %v284_v17, %v88_v10  ;;  %v313_v22 = vsel %vm296_vm5, %v279_v12, %v305_v14  ;;  %v689_v23 = vpack.c.bf16 %v312_v19, %v310_v18 }
 0x122   :  { %v687_v24 = vpack.c.bf16 %v313_v22, %v311_v21  ;;  %v306_v27 = vmul.f32 %v975_v3, %v283_v16  ;;  %vm297_vm6 = vcmp.gt.f32.partialorder %v283_v16, 0.0 }
 0x123   :  { %v288_v26 = vpop.f32.mrb[6].mxu0  ;;  %v307_v30 = vmul.f32 %v975_v3, %v285_v20  ;;  %vm298_vm7 = vcmp.gt.f32.partialorder %v285_v20, 0.0 }
 0x124   :  { %v289_v28 = vadd.f32 %v288_v26, %v93_v25  ;;  %v290_v29 = vpop.f32.mrb[7].mxu0  ;;  %688 = vmatprep.subr.bf16.mxu1 %v687_v24  ;;  %v314_v34 = vsel %vm297_vm6, %v283_v16, %v306_v27 }
 0x125   :  { %v291_v31 = vadd.f32 %v290_v29, %v93_v25  ;;  %690 = vmatpush1.bf16.msra.mxu1 %v689_v23  ;;  %v315_v36 = vsel %vm298_vm7, %v285_v20, %v307_v30 }
 0x126   :  { %vm299_vm8 = vcmp.gt.f32.partialorder %v289_v28, 0.0  ;;  %v308_v32 = vmul.f32 %v975_v3, %v289_v28 }
 0x127   :  { %vm300_vm9 = vcmp.gt.f32.partialorder %v291_v31, 0.0  ;;  %v309_v33 = vmul.f32 %v975_v3, %v291_v31 }
 0x128   :  { %v316_v35 = vsel %vm299_vm8, %v289_v28, %v308_v32 }
 0x129   :  { %v317_v37 = vsel %vm300_vm9, %v291_v31, %v309_v33  ;;  %v693_v38 = vpack.c.bf16 %v316_v35, %v314_v34 }
 0x12a   :  { %v691_v39 = vpack.c.bf16 %v317_v37, %v315_v36 }
 0x12c   :  { %692 = vmatprep.subr.bf16.mxu1 %v691_v39 }
 0x12d   :  { %694 = vmatpush1.bf16.msra.mxu1 %v693_v38 }
 0x130   :  { %594 = vmatmul.mubr.msk.f32.vlgmr.msra.gmra.mrb[0].mxu1 %vm95_vm0, %v318_v40 }
 0x131   :  { %408 = vmatprep.mubr.f32.mxu1 %v737_v62 }
 0x134   :  { %595 = vmatmul.mubr.msk.f32.gmra.mrb[2].mxu1 %vm95_vm0, %v319_v41 }
 0x135   :  { %502 = vmatprep.mubr.f32.mxu1 %v737_v62 }
 0x203   :  { %v404_v43 = vpop.f32.mrb[0].mxu1 }
 0x204   :  { %v405_v44 = vadd.f32 %v404_v43, %v325_v42  ;;  %v406_v45 = vpop.f32.mrb[1].mxu1 }
 0x205   :  { %v407_v46 = vadd.f32 %v406_v45, %v325_v42 }
 0x206   :  { %v419_v49 = vmul.f32 %v405_v44, %v975_v3  ;;  %vm415_vm10 = vcmp.gt.f32.partialorder %v405_v44, 0.0 }
 0x207   :  { %v410_v48 = vpop.f32.mrb[2].mxu1  ;;  %v420_v52 = vmul.f32 %v407_v46, %v975_v3  ;;  %vm416_vm11 = vcmp.gt.f32.partialorder %v407_v46, 0.0 }
 0x208   :  { %v411_v50 = vadd.f32 %v410_v48, %v330_v47  ;;  %v412_v51 = vpop.f32.mrb[3].mxu1  ;;  %v423_v56 = vsel %vm415_vm10, %v405_v44, %v419_v49 }
 0x209   :  { %v413_v53 = vadd.f32 %v412_v51, %v330_v47  ;;  %v424_v59 = vsel %vm416_vm11, %v407_v46, %v420_v52 }
 0x20a   :  { %vm417_vm12 = vcmp.gt.f32.partialorder %v411_v50, 0.0  ;;  %v421_v54 = vmul.f32 %v411_v50, %v975_v3 }
 0x20b   :  { %vm418_vm13 = vcmp.gt.f32.partialorder %v413_v53, 0.0  ;;  %v422_v55 = vmul.f32 %v413_v53, %v975_v3 }
 0x20c   :  { %v425_v57 = vsel %vm417_vm12, %v411_v50, %v421_v54 }
 0x20d   :  { %v697_v58 = vpack.c.bf16 %v425_v57, %v423_v56  ;;  %v426_v60 = vsel %vm418_vm13, %v413_v53, %v422_v55 }
 0x20e   :  { %v695_v61 = vpack.c.bf16 %v426_v60, %v424_v59 }
 0x210   :  { %696 = vmatprep.subr.bf16.mxu1 %v695_v61 }
 0x211   :  { %698 = vmatpush1.bf16.msra.mxu1 %v697_v58 }
 0x214   :  { %596 = vmatmul.mubr.msk.f32.vlgmr.msra.gmra.mrb[4].mxu1 %vm434_vm14, %v427_v63 }
 0x2e7   :  { %v504_v1 = vpop.f32.mrb[4].mxu1 }
 0x2e8   :  { %v505_v2 = vadd.f32 %v504_v1, %v432_v0  ;;  %v506_v4 = vpop.f32.mrb[5].mxu1 }
 0x2e9   :  { %v507_v5 = vadd.f32 %v506_v4, %v432_v0 }
 0x2ea   :  { %v509_v3 = vsub.f32 0.0, %v505_v2  ;;  %vm527_vm15 = vcmp.gt.f32.partialorder %v505_v2, %v525_v13 }
 0x2eb   :  { %v510_v6 = vsub.f32 0.0, %v507_v5  ;;  %vm528_vm0 = vcmp.gt.f32.partialorder %v507_v5, %v525_v13  ;;  %v597_v14 = vsel %vm527_vm15, 1.0, %v737_v62 }
 0x2ec   :  { %v511_v7 = vmul.f32 1.442695, %v509_v3  ;;  %v598_v15 = vsel %vm528_vm0, 1.0, %v737_v62  ;;  %v535_v16 = vrot.slane %v597_v14, 4 }
 0x2ed   :  { %v513_v8 = vmul.f32 1.442695, %v510_v6  ;;  %v536_v18 = vrot.slane %v598_v15, 4 }
 0x2ee   :  { %704 = vpow2.f32 %v511_v7 }
 0x2ef   :  { %706 = vpow2.f32 %v513_v8 }
 0x2f8   :  { %v705_v9 = vpop.eup %704 }
 0x2f9   :  { %v707_v10 = vpop.eup %706  ;;  %v515_v11 = vadd.f32 1.0, %v705_v9 }
 0x2fa   :  { %v516_v12 = vadd.f32 1.0, %v707_v10 }
 0x2fb   :  { %708 = vrcp.f32 %v515_v11 }
 0x2fc   :  { %710 = vrcp.f32 %v516_v12 }
 0x305   :  { %v709_v17 = vpop.eup %708 }
 0x306   :  { %v711_v19 = vpop.eup %710  ;;  %v540_v20 = vsel %vm539_vm1, %v709_v17, %v535_v16 }
 0x307   :  { %v541_v21 = vsel %vm539_vm1, %v711_v19, %v536_v18  ;;  %542 = vst [vmem:[#allocation3] sm:$0xff] %v540_v20 }
 0x308   :  { %543 = vst [vmem:[#allocation3 + $0x8] sm:$0xff] %v541_v21 }
 0x309   :  { %723 = shalt.err (!%p720_p4)
}
 0x30a   :  { %s724_s12 = scalar_lea.hbm %s1025_s9, 256 }
 0x30b   :  { %p725_p5 = scmp.ne.s32.totalorder %s1025_s9, %s724_s12  ;;  %p728_p6 = scmp.lt.u32.totalorder %s724_s12, %s1025_s9 }
 0x30d   :  { %p730_p7 = pnand %p728_p6, %p725_p5 }
 0x30f   :  { %733 = shalt.err (!%p730_p7)
}
 0x310   :  { %553 = dma.vmem_to_hbm [thread:$0]  %s551_s2, 256, %s1025_s9, [#allocation4]  }
 0x311   :  { %734 = dma.done.wait [#allocation4], 256  }
 0x312   :  { %735 = vsyncadd [#allocation4], 4294967040 }
 0x313   :  { %557 = vsyncpa [#allocation4], 1 }

</bundles_post_ra>
